<compile_context>
chip_gen: v6e
topology: v6e:2x2x1
jax: 0.10.0
libtpu: 0.0.40
codegen_flags: <defaults>
</compile_context>

<pallas_src>
import functools

import jax
import jax.numpy as jnp
from jax.experimental import pallas as pl
from jax.experimental.pallas import tpu as pltpu

LANE = 128
DEFAULT_BLOCK_ROWS = 4096  # 4096x128 f32 = 2 MiB per input per pipeline buffer


def _sublane_multiple(dtype) -> int:
    """Minimum sublane tile for a dtype: 8 (>=32-bit), 16 (16-bit), 32 (8-bit)."""
    size = jnp.dtype(dtype).itemsize
    if size >= 4:
        return 8
    if size == 2:
        return 16
    return 32


def _dice_bce_kernel(x_ref, t_ref, out_ref, *, tail_rows):
    """Per-block partial sums for DiceBCE.

    Writes an (8, LANE) f32 block: rows 0..3 hold the per-lane partial sums of
    sigmoid(x), t, sigmoid(x)*t and BCE(x, t); rows 4..7 are zero.  Only the
    last grid block (and only when it is ragged, i.e. tail_rows > 0) pays for
    row-validity masking.
    """
    x = x_ref[...].astype(jnp.float32)
    t = t_ref[...].astype(jnp.float32)

    # Stable sigmoid + logits-form BCE sharing one exp(-|x|) (EUP):
    #   sigmoid(x) = where(x >= 0, 1, e) * 1/(1+e),   e = exp(-|x|)
    #   bce(x, t)  = max(x, 0) - x*t + log(1+e)
    # Note: PyTorch's binary_cross_entropy clamps each log term at -100; that
    # only differs from the logits form when |x| > ~100 (bounded, tiny).
    e = jnp.exp(-jnp.abs(x))
    log1pe = jnp.log(1.0 + e)
    p = jnp.where(x >= 0.0, 1.0, e) * pl.reciprocal(1.0 + e, approx=False)
    bce = jnp.maximum(x, 0.0) - x * t + log1pe

    zeros4 = jnp.zeros((4, LANE), jnp.float32)

    def reduce_and_store(pv, tv, bv):
        sp = jnp.sum(pv, axis=0, keepdims=True)          # (1, LANE)
        st = jnp.sum(tv, axis=0, keepdims=True)
        spt = jnp.sum(pv * tv, axis=0, keepdims=True)
        sb = jnp.sum(bv, axis=0, keepdims=True)
        out_ref[...] = jnp.concatenate([sp, st, spt, sb, zeros4], axis=0)

    if tail_rows == 0:
        # Every block is fully valid: no mask work at all.
        reduce_and_store(p, t, bce)
    else:
        is_last = pl.program_id(0) == pl.num_programs(0) - 1

        @pl.when(pl.program_id(0) < pl.num_programs(0) - 1)
        def _():
            reduce_and_store(p, t, bce)

        @pl.when(is_last)
        def _():
            # Only the ragged last block builds a (row-level) validity mask;
            # garbage rows are select-ed to zero before any multiply/sum.
            row_idx = jax.lax.broadcasted_iota(jnp.int32, x.shape, 0)
            valid = row_idx < tail_rows
            zero = jnp.zeros_like(x)
            reduce_and_store(jnp.where(valid, p, zero),
                             jnp.where(valid, t, zero),
                             jnp.where(valid, bce, zero))


def _partial_sums_jax(x, t):
    """Plain-JAX partial sums for the (<128-element) tail."""
    x = x.astype(jnp.float32)
    t = t.astype(jnp.float32)
    e = jnp.exp(-jnp.abs(x))
    p = jnp.where(x >= 0.0, 1.0, e) / (1.0 + e)
    bce = jnp.maximum(x, 0.0) - x * t + jnp.log(1.0 + e)
    return jnp.sum(p), jnp.sum(t), jnp.sum(p * t), jnp.sum(bce)


def dice_bce_loss(logits, targets, smooth=1.0, block_rows=DEFAULT_BLOCK_ROWS):
    """DiceBCELoss forward (sigmoid + dice + mean BCE).

    logits / targets may be passed in narrow dtypes (e.g. bf16 logits,
    bf16/int8 targets); the cast to f32 happens inside the kernel so HBM
    traffic stays at the narrow width.
    """
    x_flat = logits.reshape(-1)
    t_flat = targets.reshape(-1)
    n = x_flat.shape[0]

    full_rows = n // LANE
    tail = n - full_rows * LANE

    sp = jnp.float32(0.0)
    st = jnp.float32(0.0)
    spt = jnp.float32(0.0)
    sb = jnp.float32(0.0)

    if full_rows > 0:
        rows = full_rows
        if tail:
            x2 = x_flat[: rows * LANE].reshape(rows, LANE)
            t2 = t_flat[: rows * LANE].reshape(rows, LANE)
        else:
            x2 = x_flat.reshape(rows, LANE)
            t2 = t_flat.reshape(rows, LANE)

        sub = max(_sublane_multiple(x2.dtype), _sublane_multiple(t2.dtype))
        br = min(block_rows, rows)
        if br < rows:
            br = max(sub, (br // sub) * sub)
        elif rows >= 2 * sub:
            # Whole array fits in one block: split it so the "parallel" 1-D
            # grid can shard across both v7x TensorCores.
            br = ((pl.cdiv(rows, 2) + sub - 1) // sub) * sub
        num_blocks = pl.cdiv(rows, br)
        tail_rows = rows % br  # 0 -> last block is full, no in-kernel masking

        in_spec = pl.BlockSpec((br, LANE), lambda i: (i, 0))
        kernel = functools.partial(_dice_bce_kernel, tail_rows=int(tail_rows))

        partials = pl.pallas_call(
            kernel,
            out_shape=jax.ShapeDtypeStruct((num_blocks * 8, LANE), jnp.float32),
            grid_spec=pltpu.PrefetchScalarGridSpec(
                num_scalar_prefetch=0,
                grid=(num_blocks,),
                in_specs=[in_spec, in_spec],
                out_specs=pl.BlockSpec((8, LANE), lambda i: (i, 0)),
            ),
            compiler_params=pltpu.CompilerParams(
                dimension_semantics=("parallel",)),
        )(x2, t2)

        sums = jnp.sum(partials.reshape(num_blocks, 8, LANE), axis=(0, 2))
        sp, st, spt, sb = sums[0], sums[1], sums[2], sums[3]

    if tail > 0:
        # <=127-element tail handled in plain JAX (avoids a full jnp.pad copy
        # of both streams).
        tsp, tst, tspt, tsb = _partial_sums_jax(x_flat[full_rows * LANE:],
                                                t_flat[full_rows * LANE:])
        sp = sp + tsp
        st = st + tst
        spt = spt + tspt
        sb = sb + tsb

    dice_loss = 1.0 - (2.0 * spt + smooth) / (sp + st + smooth)
    bce_mean = sb / n
    return bce_mean + dice_loss


def _reference(logits, targets, smooth=1.0):
    """Pure-JAX replica of the PyTorch DiceBCELoss forward."""
    p = jax.nn.sigmoid(logits.astype(jnp.float32)).reshape(-1)
    t = targets.reshape(-1).astype(jnp.float32)
    intersection = jnp.sum(p * t)
    dice = 1.0 - (2.0 * intersection + smooth) / (jnp.sum(p) + jnp.sum(t) + smooth)
    log_p = jnp.maximum(jnp.log(p), -100.0)
    log_1mp = jnp.maximum(jnp.log(1.0 - p), -100.0)
    bce = -jnp.mean(t * log_p + (1.0 - t) * log_1mp)
    return bce + dice


if __name__ == "__main__":
    key = jax.random.PRNGKey(0)
    k1, k2 = jax.random.split(key)
    # NCHW logits and binary targets, consistent with a segmentation head.
    x = jax.random.normal(k1, (2, 4, 16, 16), dtype=jnp.float32)
    tgt = (jax.random.uniform(k2, (2, 4, 16, 16)) > 0.5).astype(jnp.float32)

    loss = dice_bce_loss(x, tgt, smooth=1.0)
    jax.block_until_ready(loss)

    ref = _reference(x, tgt, smooth=1.0)
    assert jnp.allclose(loss, ref, atol=1e-5, rtol=1e-5), (loss, ref)
    print("KERNEL_OK")
</pallas_src>

<mosaic_0001>
module attributes {stable_mosaic.version = 11 : i64} {
  func.func @_dice_bce_kernel(%arg0: i32, %arg1: memref<8x128xf32, #tpu.memory_space<vmem>>, %arg2: memref<8x128xf32, #tpu.memory_space<vmem>>, %arg3: memref<8x128xf32, #tpu.memory_space<vmem>>) attributes {dimension_semantics = [#tpu.dimension_semantics<parallel>], iteration_bounds = array<i64: 2>, scalar_prefetch = 0 : i64, scratch_operands = 0 : i64, tpu.core_type = #tpu.core_type<tc>, window_params = [{transform_indices = @transform_0, window_bounds = array<i64: 8, 128>}, {transform_indices = @transform_1, window_bounds = array<i64: 8, 128>}, {transform_indices = @transform_2, window_bounds = array<i64: 8, 128>}]} {
    %c0 = arith.constant 0 : index
    %c0_0 = arith.constant 0 : index
    %0 = vector.load %arg1[%c0, %c0_0] : memref<8x128xf32, #tpu.memory_space<vmem>>, vector<8x128xf32>
    %c0_1 = arith.constant 0 : index
    %c0_2 = arith.constant 0 : index
    %1 = vector.load %arg2[%c0_1, %c0_2] : memref<8x128xf32, #tpu.memory_space<vmem>>, vector<8x128xf32>
    %2 = math.absf %0 : vector<8x128xf32>
    %cst = arith.constant 0.000000e+00 : f32
    %3 = vector.broadcast %cst : f32 to vector<8x128xf32>
    %4 = arith.subf %3, %2 : vector<8x128xf32>
    %5 = math.exp %4 : vector<8x128xf32>
    %cst_3 = arith.constant 1.000000e+00 : f32
    %6 = vector.broadcast %cst_3 : f32 to vector<8x128xf32>
    %7 = arith.addf %6, %5 : vector<8x128xf32>
    %8 = math.log %7 : vector<8x128xf32>
    %cst_4 = arith.constant 0.000000e+00 : f32
    %9 = vector.broadcast %cst_4 : f32 to vector<8x128xf32>
    %10 = arith.cmpf oge, %0, %9 : vector<8x128xf32>
    %cst_5 = arith.constant 1.000000e+00 : f32
    %11 = vector.broadcast %cst_5 : f32 to vector<8x128xf32>
    %12 = arith.select %10, %11, %5 : vector<8x128xi1>, vector<8x128xf32>
    %cst_6 = arith.constant 1.000000e+00 : f32
    %13 = vector.broadcast %cst_6 : f32 to vector<8x128xf32>
    %14 = arith.addf %13, %5 : vector<8x128xf32>
    %15 = tpu.reciprocal %14 : vector<8x128xf32> -> vector<8x128xf32>
    %16 = arith.mulf %12, %15 : vector<8x128xf32>
    %cst_7 = arith.constant 0.000000e+00 : f32
    %17 = vector.broadcast %cst_7 : f32 to vector<8x128xf32>
    %18 = arith.maximumf %0, %17 : vector<8x128xf32>
    %19 = arith.mulf %0, %1 : vector<8x128xf32>
    %20 = arith.subf %18, %19 : vector<8x128xf32>
    %21 = arith.addf %20, %8 : vector<8x128xf32>
    %cst_8 = arith.constant 0.000000e+00 : f32
    %22 = vector.broadcast %cst_8 : f32 to vector<4x128xf32>
    %cst_9 = arith.constant dense<0.000000e+00> : vector<128xf32>
    %23 = vector.multi_reduction <add>, %16, %cst_9 [0] : vector<8x128xf32> to vector<128xf32>
    %24 = vector.shape_cast %23 : vector<128xf32> to vector<1x128xf32>
    %cst_10 = arith.constant dense<0.000000e+00> : vector<128xf32>
    %25 = vector.multi_reduction <add>, %1, %cst_10 [0] : vector<8x128xf32> to vector<128xf32>
    %26 = vector.shape_cast %25 : vector<128xf32> to vector<1x128xf32>
    %27 = arith.mulf %16, %1 : vector<8x128xf32>
    %cst_11 = arith.constant dense<0.000000e+00> : vector<128xf32>
    %28 = vector.multi_reduction <add>, %27, %cst_11 [0] : vector<8x128xf32> to vector<128xf32>
    %29 = vector.shape_cast %28 : vector<128xf32> to vector<1x128xf32>
    %cst_12 = arith.constant dense<0.000000e+00> : vector<128xf32>
    %30 = vector.multi_reduction <add>, %21, %cst_12 [0] : vector<8x128xf32> to vector<128xf32>
    %31 = vector.shape_cast %30 : vector<128xf32> to vector<1x128xf32>
    %32 = tpu.concatenate %24, %26, %29, %31, %22 in 0 : vector<1x128xf32>, vector<1x128xf32>, vector<1x128xf32>, vector<1x128xf32>, vector<4x128xf32> -> vector<8x128xf32>
    %c0_13 = arith.constant 0 : index
    %c0_14 = arith.constant 0 : index
    %33 = vector.load %arg3[%c0_13, %c0_14] : memref<8x128xf32, #tpu.memory_space<vmem>>, vector<8x128xf32>
    tpu.vector_store %arg3[%c0_13, %c0_14], %32 {strides = array<i32>} : memref<8x128xf32, #tpu.memory_space<vmem>>, vector<8x128xf32>,
    return
  }
  func.func @transform_0(%arg0: i32) -> (i32, i32) {
    %c0_i32 = arith.constant 0 : i32
    %c0_i32_0 = arith.constant 0 : i32
    return %arg0, %c0_i32 : i32, i32
  }
  func.func @transform_1(%arg0: i32) -> (i32, i32) {
    %c0_i32 = arith.constant 0 : i32
    %c0_i32_0 = arith.constant 0 : i32
    return %arg0, %c0_i32 : i32, i32
  }
  func.func @transform_2(%arg0: i32) -> (i32, i32) {
    %c0_i32 = arith.constant 0 : i32
    %c0_i32_0 = arith.constant 0 : i32
    return %arg0, %c0_i32 : i32, i32
  }
}

</mosaic_0001>

<bundles_post_ra>
// kernel: tpu_custom_call.1
= control target key start
LH: loop header
LB: loop body
LE: loop exit
PB: predicated region body
PF: predicated region fallthrough
CT: control target
= control target key end

     0   :  { %7 = vsyncpa [#allocation3], 0  ;;  %s775_s0 = inlined_call_operand.hbm [shape: f32[16,128], index: 0, kind: input, shape index: {}]   ;;  %s776_s1 = inlined_call_operand.hbm [shape: f32[16,128], index: 1, kind: input, shape index: {}]   ;;  %s777_s2 = inlined_call_operand.hbm [shape: f32[16,128], index: 2, kind: output, shape index: {}]  }
   0x1   :  { %9 = vsyncpa [#allocation3 + $0x1], 0 }
   0x2   :  { %10 = vsyncpa [#allocation6], 0 }
   0x3   :  { %12 = vsyncpa [#allocation6 + $0x1], 0 }
   0x4   :  { %13 = vsyncpa [#allocation4], 0 }
   0x5   :  { %15 = vsyncpa [#allocation4 + $0x1], 0  ;;  %s570_s9 = smov 0   ;;  %s572_s10 = smov 0  }
   0x6   :  { %s574_s11 = smov 0   ;;  %s576_s12 = smov 0  }
   0x7 LB: > { %s591_s13 = sadd.s32 4294967295, %s550_s12   ;;  %s354_s14 = sadd.s32 4294967294, %s550_s12   ;;  %s550_s12 = sphi %s576_s12, %s796_s12   ;;  %s546_s11 = sphi %s574_s11, %s795_s11   ;;  %s542_s10 = sphi %s572_s10, %s794_s10   ;;  %s538_s9 = sphi %s570_s9, %s793_s9  }
   0x8   : > { %s595_s15 = sadd.s32 1, %s550_s12   ;;  %s28_s16 = sadd.s32 1, %s546_s11 }
   0x9   : > { %s25_s17 = ssub.s32 %s550_s12, %s595_s15  ;;  %p35_p0 = scmp.ne.s32.totalorder %s546_s11, %s542_s10 }
   0xa   : > { %p26_p1 = scmp.eq.s32.totalorder %s25_s17, 0  ;;  %p36_p2 = scmp.eq.s32.totalorder %s550_s12, 0 }
   0xb   : > { %p41_p3 = scmp.ne.s32.totalorder %s542_s10, %s538_s9  ;;  %p42_p4 = scmp.eq.s32.totalorder %s591_s13, 0 }
   0xc   : > { %s607_s18 = scalar_select %p26_p1, %s546_s11, %s28_s16  }
   0xd   : > { %p609_p5 = por %p36_p2, %p35_p0  ;;  %p613_p6 = por %p42_p4, %p41_p3 }
   0xe   : > { %p91_p7 = scmp.eq.s32.totalorder %s591_s13, 1  ;;  %p97_p8 = scmp.eq.s32.totalorder %s354_s14, 1 }
   0xf   : > { %s781_s20 = scalar_select %p613_p6, 1, 0 }
  0x10   : > { %p386_p10 = scmp.lt.s32.totalorder %s550_s12, 2  ;;  %p620_p11 = por %p91_p7, %p35_p0 }
  0x11   : > { %p624_p12 = por %p97_p8, %p41_p3  ;;  %s629_s23 = sand.u32 1, %s546_s11  }
  0x12   : > { %s782_s21 = scalar_select %p620_p11, 1, 0 }
  0x13   : > { %s783_s22 = scalar_select %p624_p12, 1, 0 }
  0x14   : > { %s358_s24 = sshll.u32 %s550_s12, 7  ;;  %s357_s25 = sshll.u32 %s629_s23, 3 }
  0x15   : > { %s638_s28 = scalar_lea.hbm %s775_s0, %s358_s24  ;;  %s121_s29 = scalar_lea.vmem [#allocation2], %s357_s25 }
  0x16   : > { %s128_s30 = sshll.u32 %s121_s29, 4  ;;  %p644_p13 = pnand %p386_p10, %p609_p5  ;;  %s648_s30 = int_to_ptr.vmem [resolvable:$true] %s128_s30 }
  0x17   : > { %s118_s4 = scalar_lea.sflag [#allocation3], %s629_s23  ;;  %s426_s5 = scalar_lea.hbm %s638_s28, 128 }
  0x18   : > { %p427_p2 = scmp.ne.s32.totalorder %s638_s28, %s426_s5  ;;  %p428_p3 = pneg %p644_p13 }
  0x19   : > { %s431_s8 = scalar_lea.hbm %s775_s0, 256  ;;  %p432_p5 = scmp.lt.s32.totalorder %s638_s28, %s775_s0 }
  0x1a   : > { %p429_p4 = pnand %p428_p3, %p427_p2  ;;  %p433_p8 = scmp.lt.s32.totalorder %s431_s8, %s426_s5 }
  0x1c   : > { %p430_p7 = pneg %p429_p4  ;;  %p434_p10 = por %p433_p8, %p432_p5 }
  0x1e   : > { %p435_p9 = pnand %p434_p10, %p430_p7 }
  0x20   : > { %438 = shalt.err (!%p435_p9)
}
  0x21   : > { %s439_s17 = scalar_lea.vmem %s648_s30, 128  ;;  %s552_s19 = smov [#allocation2]  }
  0x22   : > { %p440_p0 = scmp.ne.s32.totalorder %s648_s30, %s439_s17  ;;  %s444_s26 = sshll.u32 %s552_s19, 4  ;;  %s445_s26 = int_to_ptr.vmem [resolvable:$false] %s444_s26 }
  0x23   : > { %s446_s27 = scalar_lea.vmem %s445_s26, 256  ;;  %p447_p1 = scmp.lt.s32.totalorder %s648_s30, %s445_s26 }
  0x24   : > { %p442_p2 = pnand %p440_p0, %p428_p3  ;;  %p448_p12 = scmp.lt.s32.totalorder %s446_s27, %s439_s17 }
  0x26   : > { %p443_p4 = pneg %p442_p2  ;;  %p449_p11 = por %p448_p12, %p447_p1 }
  0x28   : > { %p450_p5 = pnand %p449_p11, %p443_p4 }
  0x2a   : > { %453 = shalt.err (!%p450_p5)
}
  0x2b   : > { %378 = dma.hbm_to_vmem [thread:$0]  (!%p644_p13), %s638_s28, 128, %s648_s30, %s118_s4  }
  0x2c   : > { %p785_p9 = scmp.lt.s32.totalorder %s550_s12, 3  ;;  %p786_p0 = scmp.ge.s32.totalorder %s550_s12, 1 }
  0x2d   : > { %s690_s7 = scalar_lea.hbm %s776_s1, %s358_s24  ;;  %s139_s8 = scalar_lea.vmem [#allocation5], %s357_s25 }
  0x2e   : > { %p681_p7 = pnand %p786_p0, %p785_p9  ;;  %s146_s14 = sshll.u32 %s139_s8, 4  ;;  %s147_s14 = int_to_ptr.vmem [resolvable:$true] %s146_s14 }
  0x2f   : > { %s136_s28 = scalar_lea.sflag [#allocation6], %s629_s23  ;;  %s454_s30 = scalar_lea.hbm %s690_s7, 128 }
  0x30   : > { %s787_s29 = scalar_select %p681_p7, 1, 0 }
  0x31   : > { %p455_p11 = scmp.ne.s32.totalorder %s690_s7, %s454_s30  ;;  %s459_s17 = scalar_lea.hbm %s776_s1, 256 }
  0x32   : > { %p460_p8 = scmp.lt.s32.totalorder %s690_s7, %s776_s1  ;;  %p461_p10 = scmp.lt.s32.totalorder %s459_s17, %s454_s30 }
  0x33   : > { %p457_p12 = pnand %p455_p11, %p428_p3 }
  0x34   : > { %p462_p2 = por %p461_p10, %p460_p8 }
  0x35   : > { %p458_p1 = pneg %p457_p12 }
  0x37   : > { %p463_p4 = pnand %p462_p2, %p458_p1 }
  0x39   : > { %466 = shalt.err (!%p463_p4)
}
  0x3a   : > { %s467_s25 = scalar_lea.vmem %s147_s14, 128  ;;  %s553_s23 = smov [#allocation5]  }
  0x3b   : > { %p468_p5 = scmp.ne.s32.totalorder %s147_s14, %s467_s25  ;;  %s472_s26 = sshll.u32 %s553_s23, 4  ;;  %s473_s26 = int_to_ptr.vmem [resolvable:$false] %s472_s26 }
  0x3c   : > { %s474_s27 = scalar_lea.vmem %s473_s26, 256  ;;  %p475_p11 = scmp.lt.s32.totalorder %s147_s14, %s473_s26 }
  0x3d   : > { %p470_p9 = pnand %p468_p5, %p428_p3  ;;  %p476_p12 = scmp.lt.s32.totalorder %s474_s27, %s467_s25 }
  0x3f   : > { %p471_p0 = pneg %p470_p9  ;;  %p477_p6 = por %p476_p12, %p475_p11 }
  0x41   : > { %p478_p7 = pnand %p477_p6, %p471_p0 }
  0x43   : > { %481 = shalt.err (!%p478_p7)
}
  0x44   : > { %381 = dma.hbm_to_vmem [thread:$0]  (!%p644_p13), %s690_s7, 128, %s147_s14, %s136_s28  }
  0x45   : > { %p788_p1 = scmp.ne.s32.totalorder %s787_s29, 0 }
  0x46   : > { %s716_s5 = sand.u32 (!%p788_p1), 1, %s542_s10   ;;  %p789_p6 = scmp.ne.s32.totalorder (!%p788_p1), %s781_s20, 0 }
  0x47   : > { %155 = sbr.rel (%p788_p1) target bundleno = 149 (0x95), region = 28  ;;  %s719_s6 = sshll.u32 (!%p788_p1), %s716_s5, 3 }
  0x48   : > { %s158_s8 = scalar_lea.sflag (!%p788_p1), [#allocation3], %s716_s5  ;;  %s161_s30 = scalar_lea.vmem (!%p788_p1), [#allocation2], %s719_s6 }
  0x4c   : > { %525 = dma.done.wait (%p789_p6), %s158_s8, 128  }
  0x4d   : > { %527 = vsyncadd (%p789_p6), %s158_s8, 4294967168  ;;  %s167_s3 = scalar_lea.sflag [#allocation6], %s716_s5  ;;  %s170_s29 = scalar_lea.vmem [#allocation5], %s719_s6 }
  0x4e   : > { %529 = dma.done.wait (%p789_p6), %s167_s3, 128  }
  0x4f   : > { %531 = vsyncadd (%p789_p6), %s167_s3, 4294967168  ;;  %v196_v0 = vld [vmem:[%s161_s30] sm:$0xff]  ;;  %v197_v6 = vld [vmem:[%s170_s29] sm:$0xff]  ;;  %vm238_vm1 = vcmask 1040384   ;;  %vm240_vm2 = vcmask 1041408   ;;  %vm242_vm3 = vcmask 1042432  }
  0x50   : > { %v198_v1 = vand.u32 2147483647, %v196_v0  ;;  %v219_v7 = vrot.slane %v197_v6, 4  ;;  %v209_v8 = vmax.f32 %v196_v0, 0.0  ;;  %v210_v9 = vmul.f32 %v197_v6, %v196_v0  ;;  %s195_s20 = scalar_lea.vmem [#allocation7], %s719_s6  ;;  %s366_s14 = sshll.u32 %s591_s13, 7 }
  0x51   : > { %vm205_vm0 = vcmp.ge.f32.partialorder %v196_v0, 0.0  ;;  %s261_s7 = sshll.u32 %s195_s20, 4  ;;  %vm244_vm4 = vcmask 1043456   ;;  %s259_s16 = scalar_lea.hbm %s777_s2, %s366_s14  ;;  %s735_s7 = int_to_ptr.vmem [resolvable:$true] %s261_s7 }
  0x52   : > { %v199_v2 = vsub.f32 0.0, %v198_v1  ;;  %v220_v10 = vadd.f32 %v219_v7, %v197_v6  ;;  %v211_v12 = vsub.f32 %v209_v8, %v210_v9  ;;  %s248_s17 = scalar_lea.sflag [#allocation4], %s716_s5  ;;  %s482_s24 = scalar_lea.vmem %s735_s7, 128 }
  0x53   : > { %p483_p13 = scmp.ne.s32.totalorder %s735_s7, %s482_s24  ;;  %p790_p3 = scmp.ne.s32.totalorder %s782_s21, 0 }
  0x54   : > { %v200_v3 = vmul.f32 1.442695, %v199_v2  ;;  %v221_v14 = vrot.slane %v220_v10, 2  ;;  %s554_s13 = smov [#allocation7]  }
  0x55   : > { %p484_p7 = pnand %p483_p13, %p790_p3  ;;  %s486_s19 = sshll.u32 %s554_s13, 4  ;;  %s487_s19 = int_to_ptr.vmem [resolvable:$false] %s486_s19 }
  0x56   : > { %420 = vpow2.f32 %v200_v3  ;;  %v222_v20 = vadd.f32 %v221_v14, %v220_v10  ;;  %s488_s25 = scalar_lea.vmem %s487_s19, 256  ;;  %p489_p10 = scmp.lt.s32.totalorder %s735_s7, %s487_s19 }
  0x57   : > { %p485_p8 = pneg %p484_p7  ;;  %p490_p2 = scmp.lt.s32.totalorder %s488_s25, %s482_s24 }
  0x58   : > { %v223_v27 = vrot.slane %v222_v20, 1 }
  0x59   : > { %p491_p4 = por %p490_p2, %p489_p10 }
  0x5a   : > { %v224_v34 = vadd.f32 %v223_v27, %v222_v20 }
  0x5b   : > { %p492_p5 = pnand %p491_p4, %p485_p8 }
  0x63   : > { %v421_v4 = vpop.eup %420 }
  0x64   : > { %v202_v5 = vadd.f32 1.0, %v421_v4  ;;  %v206_v11 = vsel %vm205_vm0, 1.0, %v421_v4 }
  0x66   : > { %422 = vlog2.f32 %v202_v5 }
  0x67   : > { %424 = vrcp.f32 %v202_v5 }
  0x73   : > { %v423_v13 = vpop.eup %422 }
  0x74   : > { %v425_v15 = vpop.eup %424  ;;  %v204_v16 = vmul.f32 0.6931472, %v423_v13 }
  0x75   : > { %v208_v17 = vmul.f32 %v425_v15, %v206_v11 }
  0x76   : > { %v212_v18 = vadd.f32 %v211_v12, %v204_v16 }
  0x77   : > { %v213_v19 = vrot.slane %v208_v17, 4  ;;  %v225_v21 = vmul.f32 %v208_v17, %v197_v6 }
  0x78   : > { %v232_v22 = vrot.slane %v212_v18, 4 }
  0x79   : > { %v214_v23 = vadd.f32 %v213_v19, %v208_v17  ;;  %v226_v24 = vrot.slane %v225_v21, 4 }
  0x7a   : > { %v233_v25 = vadd.f32 %v232_v22, %v212_v18 }
  0x7b   : > { %v215_v26 = vrot.slane %v214_v23, 2  ;;  %v227_v28 = vadd.f32 %v226_v24, %v225_v21 }
  0x7c   : > { %v234_v29 = vrot.slane %v233_v25, 2 }
  0x7d   : > { %v216_v30 = vadd.f32 %v215_v26, %v214_v23  ;;  %v228_v31 = vrot.slane %v227_v28, 2 }
  0x7e   : > { %v235_v32 = vadd.f32 %v234_v29, %v233_v25 }
  0x7f   : > { %v217_v33 = vrot.slane %v216_v30, 1  ;;  %v229_v35 = vadd.f32 %v228_v31, %v227_v28 }
  0x80   : > { %v236_v36 = vrot.slane %v235_v32, 1 }
  0x81   : > { %v218_v37 = vadd.f32 %v217_v33, %v216_v30  ;;  %v230_v38 = vrot.slane %v229_v35, 1 }
  0x82   : > { %v237_v39 = vadd.f32 %v236_v36, %v235_v32 }
  0x83   : > { %v231_v40 = vadd.f32 %v230_v38, %v229_v35  ;;  %v239_v41 = vsel %vm238_vm1, %v218_v37, %v224_v34 }
  0x85   : > { %v241_v42 = vsel %vm240_vm2, %v239_v41, %v231_v40 }
  0x86   : > { %v243_v43 = vsel %vm242_vm3, %v241_v42, %v237_v39 }
  0x87   : > { %v245_v44 = vsel %vm244_vm4, %v243_v43, 0.0 }
  0x88   : > { %246 = vst [vmem:[%s195_s20] sm:$0xff] %v245_v44 }
  0x89   : > { %495 = shalt.err (!%p492_p5)
}
  0x8a   : > { %s496_s23 = scalar_lea.hbm %s259_s16, 128  ;;  %s500_s5 = scalar_lea.hbm %s777_s2, 256 }
  0x8b   : > { %p497_p9 = scmp.ne.s32.totalorder %s259_s16, %s496_s23  ;;  %p501_p12 = scmp.lt.s32.totalorder %s259_s16, %s777_s2 }
  0x8c   : > { %p502_p1 = scmp.lt.s32.totalorder %s500_s5, %s496_s23 }
  0x8d   : > { %p498_p0 = pnand %p497_p9, %p790_p3 }
  0x8e   : > { %p503_p6 = por %p502_p1, %p501_p12 }
  0x8f   : > { %p499_p11 = pneg %p498_p0 }
  0x91   : > { %p504_p13 = pnand %p503_p6, %p499_p11 }
  0x93   : > { %507 = shalt.err (!%p504_p13)
}
  0x94   : > { %373 = dma.vmem_to_hbm [thread:$0]  (%p790_p3), %s735_s7, 128, %s259_s16, %s248_s17  }
  0x95 PF: > { %s273_s30 = sand.u32 1, %s538_s9   ;;  %p791_p7 = scmp.ne.s32.totalorder %s783_s22, 0 }
  0x96   : > { %p792_p8 = scmp.ge.s32.totalorder %s550_s12, 2  ;;  %s274_s3 = scalar_lea.sflag [#allocation4], %s273_s30 }
  0x98   : > { %p383_p10 = pnand %p792_p8, %p791_p7 }
  0x9a   : > { %p384_p2 = pneg %p383_p10 }
  0x9c   : > { %533 = dma.done.wait (%p384_p2), %s274_s3, 128  }
  0x9d   : > { %535 = vsyncadd (%p384_p2), %s274_s3, 4294967168  ;;  %p18_p4 = scmp.ge.s32.totalorder %s595_s15, 4   ;;  %s793_s9 = smov %s542_s10 }
  0x9e   : > { %s794_s10 = smov %s546_s11  ;;  %s795_s11 = smov %s607_s18 }
  0x9f   : > { %s796_s12 = smov %s595_s15  ;;  %20 = sbr.rel (!%p18_p4) target bundleno = 7 (0x7), region = 86 }
  0xa4   :  { %279 = vsyncpa [#allocation3], 1 }
  0xa5   :  { %281 = vsyncpa [#allocation3 + $0x1], 1 }
  0xa6   :  { %282 = vsyncpa [#allocation6], 1 }
  0xa7   :  { %284 = vsyncpa [#allocation6 + $0x1], 1 }
  0xa8   :  { %285 = vsyncpa [#allocation4], 1 }
  0xa9   :  { %287 = vsyncpa [#allocation4 + $0x1], 1 }

</bundles_post_ra>
